<compile_context>
chip_gen: v7x
topology: tpu7x:2x2x1
jax: 0.10.0
libtpu: 0.0.40
codegen_flags: <defaults>
</compile_context>

<pallas_src>
import math

import jax
import jax.numpy as jnp
from jax.experimental import pallas as pl
from jax.experimental.pallas import tpu as pltpu

_LANE = 128


def _round_up(v, m):
    return ((v + m - 1) // m) * m


def _make_fused_kernel(batch, dims, epsilon, out_dim):
    """Fused multi-layer kernel body.

    batch   : true batch size (rows are NOT padded).
    dims    : true feature dims, len = n_layers + 1.
    epsilon : subsidy threshold, baked in as a Python constant.
    out_dim : true output feature dim (exact-shape store, no wrapper slice).

    Kernel signature:
      (coef_ref[SMEM(1,)], x_ref, w0, b0, w1, b1, ..., o_ref)
    coef = gamma * exp(-beta * step). Weights are bf16 lane-padded; biases f32.
    """
    n_layers = len(dims) - 1

    def kernel(coef_ref, x_ref, *rest):
        o_ref = rest[-1]
        wb = rest[:-1]

        # Hoist the single scalar SMEM read once; reused by every unrolled layer.
        coef = coef_ref[0]

        # First-layer activations: true-shape x, cast to bf16 for the MXU.
        a_bf16 = x_ref[...].astype(jnp.bfloat16)
        a = None

        for i in range(n_layers):
            w = wb[2 * i][...]        # bf16 (K, pout), zero-padded
            b = wb[2 * i + 1][...]    # f32  (1, pout), zero-padded

            # bf16 x bf16 matmul on the MXU, f32 accumulation.
            z = jnp.dot(a_bf16, w, preferred_element_type=jnp.float32) + b

            # Population variance over the TRUE elements. Padded columns of z are
            # exactly zero, so unmasked single-pass sums over the padded tile equal
            # sums over the true region. Constant reciprocal -> no divides.
            inv_n = 1.0 / float(batch * dims[i + 1])
            s1 = jnp.sum(z)
            s2 = jnp.sum(z * z)
            mean = s1 * inv_n
            var = s2 * inv_n - mean * mean

            # allocate_subsidy(var, epsilon, gamma, decay); coef = gamma * decay.
            subsidy = coef * jnp.maximum(0.0, epsilon - var)

            # z + subsidy, then ReLU (final layer included, as in the module).
            a = jnp.maximum(z + subsidy, 0.0)
            a_bf16 = a.astype(jnp.bfloat16)

        # Exact-shape output store: only the true output columns (no wrapper slice).
        o_ref[...] = a[:, :out_dim]

    return kernel


class SubsidyNetPallas:
    def __init__(self, input_dim, hidden_dims, output_dim,
                 epsilon=0.05, gamma=1.0, beta=0.01, seed=0):
        self.epsilon = float(epsilon)
        self.gamma = float(gamma)
        self.beta = float(beta)
        self.dims = [int(input_dim)] + [int(h) for h in hidden_dims] + [int(output_dim)]

        key = jax.random.PRNGKey(seed)
        self.params = []       # true-shape f32 params, W stored as (Din, Dout)
        self._kernel_wb = []   # kernel-facing params, built ONCE (bf16 W, f32 b)
        for idx in range(len(self.dims) - 1):
            key, sub = jax.random.split(key)
            din, dout = self.dims[idx], self.dims[idx + 1]
            # kaiming_normal_(nonlinearity='relu', mode='fan_in'): std = sqrt(2/fan_in)
            std = math.sqrt(2.0 / din)
            w = jax.random.normal(sub, (din, dout), dtype=jnp.float32) * std
            b = jnp.zeros((dout,), dtype=jnp.float32)
            self.params.append((w, b))

            # Lane-padded kernel params (zeros keep padded lanes inert):
            #   - input dim of layer 0 stays at its true size (matches true-shape x);
            #   - all other dims padded to the 128-lane width;
            #   - weights cast to bf16 (MXU-native), biases kept f32.
            pin = din if idx == 0 else _round_up(din, _LANE)
            pout = _round_up(dout, _LANE)
            w_pad = (jnp.zeros((pin, pout), jnp.float32)
                     .at[:din, :dout].set(w)
                     .astype(jnp.bfloat16))
            b_pad = jnp.zeros((1, pout), jnp.float32).at[:, :dout].set(b)
            self._kernel_wb += [w_pad, b_pad]

        # One jitted graph for the whole forward; padded params captured once.
        self._forward = jax.jit(self._forward_impl)

    def _forward_impl(self, x, step):
        # DecayScheduler(decay_type='exponential'): exp(-beta * step), computed
        # on-device from the traced step scalar; gamma folded into the same scalar.
        coef = (self.gamma * jnp.exp(-self.beta * step)).reshape(1).astype(jnp.float32)

        batch = x.shape[0]
        n_layers = len(self.dims) - 1
        kernel = _make_fused_kernel(batch, self.dims, self.epsilon, self.dims[-1])

        in_specs = (
            [pl.BlockSpec(memory_space=pltpu.MemorySpace.SMEM)]                     # coef
            + [pl.BlockSpec(memory_space=pltpu.MemorySpace.VMEM)] * (1 + 2 * n_layers)  # x, (w,b)*
        )
        out = pl.pallas_call(
            kernel,
            out_shape=jax.ShapeDtypeStruct((batch, self.dims[-1]), jnp.float32),
            in_specs=in_specs,
            out_specs=pl.BlockSpec(memory_space=pltpu.MemorySpace.VMEM),
        )(coef, x.astype(jnp.float32), *self._kernel_wb)
        return out

    def __call__(self, x, step):
        return self._forward(x, float(step))


def _reference_forward(net, x, step):
    """Pure-JAX reference (same bf16-input / f32-accumulate recipe as the kernel)."""
    decay = math.exp(-net.beta * step)
    a = x.astype(jnp.float32)
    for (w, b) in net.params:
        z = jnp.dot(a.astype(jnp.bfloat16), w.astype(jnp.bfloat16),
                    preferred_element_type=jnp.float32) + b
        var = jnp.var(z)  # population variance over all elements (unbiased=False)
        subsidy = net.gamma * jnp.maximum(0.0, net.epsilon - var) * decay
        a = jnp.maximum(z + subsidy, 0.0)
    return a


if __name__ == "__main__":
    # Small shapes consistent with the module: MLP on (batch, input_dim).
    batch = 4
    input_dim = 16
    hidden_dims = [32, 32]
    output_dim = 8
    step = 5

    key = jax.random.PRNGKey(0)
    x = jax.random.normal(key, (batch, input_dim), dtype=jnp.float32)

    net = SubsidyNetPallas(input_dim, hidden_dims, output_dim,
                           epsilon=0.05, gamma=1.0, beta=0.01, seed=0)

    out = jax.block_until_ready(net(x, step))
    ref = jax.block_until_ready(_reference_forward(net, x, step))

    assert out.shape == (batch, output_dim)
    assert jnp.allclose(out, ref, atol=1e-3, rtol=1e-3), "mismatch vs reference"

    print("KERNEL_OK")
</pallas_src>

<mosaic_0001>
module attributes {stable_mosaic.version = 11 : i64} {
  func.func @kernel(%arg0: memref<1xf32, #tpu.memory_space<smem>>, %arg1: memref<4x16xf32, #tpu.memory_space<vmem>>, %arg2: memref<16x128xbf16, #tpu.memory_space<vmem>>, %arg3: memref<1x128xf32, #tpu.memory_space<vmem>>, %arg4: memref<128x128xbf16, #tpu.memory_space<vmem>>, %arg5: memref<1x128xf32, #tpu.memory_space<vmem>>, %arg6: memref<128x128xbf16, #tpu.memory_space<vmem>>, %arg7: memref<1x128xf32, #tpu.memory_space<vmem>>, %arg8: memref<4x8xf32, #tpu.memory_space<vmem>>) attributes {dimension_semantics = [], scalar_prefetch = 0 : i64, scratch_operands = 0 : i64, tpu.core_type = #tpu.core_type<tc>} {
    %c0 = arith.constant 0 : index
    %0 = memref.load %arg0[%c0] : memref<1xf32, #tpu.memory_space<smem>>
    %c0_0 = arith.constant 0 : index
    %c0_1 = arith.constant 0 : index
    %1 = vector.load %arg1[%c0_0, %c0_1] : memref<4x16xf32, #tpu.memory_space<vmem>>, vector<4x16xf32>
    %2 = arith.truncf %1 : vector<4x16xf32> to vector<4x16xbf16>
    %c0_2 = arith.constant 0 : index
    %c0_3 = arith.constant 0 : index
    %3 = vector.load %arg2[%c0_2, %c0_3] : memref<16x128xbf16, #tpu.memory_space<vmem>>, vector<16x128xbf16>
    %c0_4 = arith.constant 0 : index
    %c0_5 = arith.constant 0 : index
    %4 = vector.load %arg3[%c0_4, %c0_5] : memref<1x128xf32, #tpu.memory_space<vmem>>, vector<1x128xf32>
    %cst = arith.constant dense<0.000000e+00> : vector<4x128xf32>
    %5 = tpu.matmul %2, %3, %cst {dimension_numbers = #tpu.dot_dimension_numbers<[1], [0], [0], [1], [0, 0, 1, 1], [], []>} : vector<4x16xbf16>, vector<16x128xbf16>, vector<4x128xf32> -> vector<4x128xf32>
    %6 = vector.broadcast %4 : vector<1x128xf32> to vector<4x128xf32>
    %7 = arith.addf %5, %6 : vector<4x128xf32>
    %8 = vector.shape_cast %7 : vector<4x128xf32> to vector<1x4x128xf32>
    %cst_6 = arith.constant dense<0.000000e+00> : vector<1xf32>
    %9 = vector.multi_reduction <add>, %8, %cst_6 [1, 2] : vector<1x4x128xf32> to vector<1xf32>
    %10 = vector.shape_cast %9 : vector<1xf32> to vector<1x1x1xf32>
    %11 = vector.extract %10[0, 0, 0] : f32 from vector<1x1x1xf32>
    %12 = arith.mulf %7, %7 : vector<4x128xf32>
    %13 = vector.shape_cast %12 : vector<4x128xf32> to vector<1x4x128xf32>
    %cst_7 = arith.constant dense<0.000000e+00> : vector<1xf32>
    %14 = vector.multi_reduction <add>, %13, %cst_7 [1, 2] : vector<1x4x128xf32> to vector<1xf32>
    %15 = vector.shape_cast %14 : vector<1xf32> to vector<1x1x1xf32>
    %16 = vector.extract %15[0, 0, 0] : f32 from vector<1x1x1xf32>
    %cst_8 = arith.constant 7.812500e-03 : f32
    %17 = arith.mulf %11, %cst_8 : f32
    %cst_9 = arith.constant 7.812500e-03 : f32
    %18 = arith.mulf %16, %cst_9 : f32
    %19 = arith.mulf %17, %17 : f32
    %20 = arith.subf %18, %19 : f32
    %cst_10 = arith.constant 5.000000e-02 : f32
    %21 = arith.subf %cst_10, %20 : f32
    %cst_11 = arith.constant 0.000000e+00 : f32
    %22 = arith.maximumf %cst_11, %21 : f32
    %23 = arith.mulf %0, %22 : f32
    %24 = vector.broadcast %23 : f32 to vector<4x128xf32>
    %25 = arith.addf %7, %24 : vector<4x128xf32>
    %cst_12 = arith.constant 0.000000e+00 : f32
    %26 = vector.broadcast %cst_12 : f32 to vector<4x128xf32>
    %27 = arith.maximumf %25, %26 : vector<4x128xf32>
    %28 = arith.truncf %27 : vector<4x128xf32> to vector<4x128xbf16>
    %c0_13 = arith.constant 0 : index
    %c0_14 = arith.constant 0 : index
    %29 = vector.load %arg4[%c0_13, %c0_14] : memref<128x128xbf16, #tpu.memory_space<vmem>>, vector<128x128xbf16>
    %c0_15 = arith.constant 0 : index
    %c0_16 = arith.constant 0 : index
    %30 = vector.load %arg5[%c0_15, %c0_16] : memref<1x128xf32, #tpu.memory_space<vmem>>, vector<1x128xf32>
    %cst_17 = arith.constant dense<0.000000e+00> : vector<4x128xf32>
    %31 = tpu.matmul %28, %29, %cst_17 {dimension_numbers = #tpu.dot_dimension_numbers<[1], [0], [0], [1], [0, 0, 1, 1], [], []>} : vector<4x128xbf16>, vector<128x128xbf16>, vector<4x128xf32> -> vector<4x128xf32>
    %32 = vector.broadcast %30 : vector<1x128xf32> to vector<4x128xf32>
    %33 = arith.addf %31, %32 : vector<4x128xf32>
    %34 = vector.shape_cast %33 : vector<4x128xf32> to vector<1x4x128xf32>
    %cst_18 = arith.constant dense<0.000000e+00> : vector<1xf32>
    %35 = vector.multi_reduction <add>, %34, %cst_18 [1, 2] : vector<1x4x128xf32> to vector<1xf32>
    %36 = vector.shape_cast %35 : vector<1xf32> to vector<1x1x1xf32>
    %37 = vector.extract %36[0, 0, 0] : f32 from vector<1x1x1xf32>
    %38 = arith.mulf %33, %33 : vector<4x128xf32>
    %39 = vector.shape_cast %38 : vector<4x128xf32> to vector<1x4x128xf32>
    %cst_19 = arith.constant dense<0.000000e+00> : vector<1xf32>
    %40 = vector.multi_reduction <add>, %39, %cst_19 [1, 2] : vector<1x4x128xf32> to vector<1xf32>
    %41 = vector.shape_cast %40 : vector<1xf32> to vector<1x1x1xf32>
    %42 = vector.extract %41[0, 0, 0] : f32 from vector<1x1x1xf32>
    %cst_20 = arith.constant 7.812500e-03 : f32
    %43 = arith.mulf %37, %cst_20 : f32
    %cst_21 = arith.constant 7.812500e-03 : f32
    %44 = arith.mulf %42, %cst_21 : f32
    %45 = arith.mulf %43, %43 : f32
    %46 = arith.subf %44, %45 : f32
    %cst_22 = arith.constant 5.000000e-02 : f32
    %47 = arith.subf %cst_22, %46 : f32
    %cst_23 = arith.constant 0.000000e+00 : f32
    %48 = arith.maximumf %cst_23, %47 : f32
    %49 = arith.mulf %0, %48 : f32
    %50 = vector.broadcast %49 : f32 to vector<4x128xf32>
    %51 = arith.addf %33, %50 : vector<4x128xf32>
    %cst_24 = arith.constant 0.000000e+00 : f32
    %52 = vector.broadcast %cst_24 : f32 to vector<4x128xf32>
    %53 = arith.maximumf %51, %52 : vector<4x128xf32>
    %54 = arith.truncf %53 : vector<4x128xf32> to vector<4x128xbf16>
    %c0_25 = arith.constant 0 : index
    %c0_26 = arith.constant 0 : index
    %55 = vector.load %arg6[%c0_25, %c0_26] : memref<128x128xbf16, #tpu.memory_space<vmem>>, vector<128x128xbf16>
    %c0_27 = arith.constant 0 : index
    %c0_28 = arith.constant 0 : index
    %56 = vector.load %arg7[%c0_27, %c0_28] : memref<1x128xf32, #tpu.memory_space<vmem>>, vector<1x128xf32>
    %cst_29 = arith.constant dense<0.000000e+00> : vector<4x128xf32>
    %57 = tpu.matmul %54, %55, %cst_29 {dimension_numbers = #tpu.dot_dimension_numbers<[1], [0], [0], [1], [0, 0, 1, 1], [], []>} : vector<4x128xbf16>, vector<128x128xbf16>, vector<4x128xf32> -> vector<4x128xf32>
    %58 = vector.broadcast %56 : vector<1x128xf32> to vector<4x128xf32>
    %59 = arith.addf %57, %58 : vector<4x128xf32>
    %60 = vector.shape_cast %59 : vector<4x128xf32> to vector<1x4x128xf32>
    %cst_30 = arith.constant dense<0.000000e+00> : vector<1xf32>
    %61 = vector.multi_reduction <add>, %60, %cst_30 [1, 2] : vector<1x4x128xf32> to vector<1xf32>
    %62 = vector.shape_cast %61 : vector<1xf32> to vector<1x1x1xf32>
    %63 = vector.extract %62[0, 0, 0] : f32 from vector<1x1x1xf32>
    %64 = arith.mulf %59, %59 : vector<4x128xf32>
    %65 = vector.shape_cast %64 : vector<4x128xf32> to vector<1x4x128xf32>
    %cst_31 = arith.constant dense<0.000000e+00> : vector<1xf32>
    %66 = vector.multi_reduction <add>, %65, %cst_31 [1, 2] : vector<1x4x128xf32> to vector<1xf32>
    %67 = vector.shape_cast %66 : vector<1xf32> to vector<1x1x1xf32>
    %68 = vector.extract %67[0, 0, 0] : f32 from vector<1x1x1xf32>
    %cst_32 = arith.constant 3.125000e-02 : f32
    %69 = arith.mulf %63, %cst_32 : f32
    %cst_33 = arith.constant 3.125000e-02 : f32
    %70 = arith.mulf %68, %cst_33 : f32
    %71 = arith.mulf %69, %69 : f32
    %72 = arith.subf %70, %71 : f32
    %cst_34 = arith.constant 5.000000e-02 : f32
    %73 = arith.subf %cst_34, %72 : f32
    %cst_35 = arith.constant 0.000000e+00 : f32
    %74 = arith.maximumf %cst_35, %73 : f32
    %75 = arith.mulf %0, %74 : f32
    %76 = vector.broadcast %75 : f32 to vector<4x128xf32>
    %77 = arith.addf %59, %76 : vector<4x128xf32>
    %cst_36 = arith.constant 0.000000e+00 : f32
    %78 = vector.broadcast %cst_36 : f32 to vector<4x128xf32>
    %79 = arith.maximumf %77, %78 : vector<4x128xf32>
    %80 = vector.extract_strided_slice %79 {offsets = [0, 0], sizes = [4, 8], strides = [1, 1]} : vector<4x128xf32> to vector<4x8xf32>
    %c0_37 = arith.constant 0 : index
    %c0_38 = arith.constant 0 : index
    %81 = vector.load %arg8[%c0_37, %c0_38] : memref<4x8xf32, #tpu.memory_space<vmem>>, vector<4x8xf32>
    tpu.vector_store %arg8[%c0_37, %c0_38], %80 {strides = array<i32>} : memref<4x8xf32, #tpu.memory_space<vmem>>, vector<4x8xf32>,
    return
  }
}

</mosaic_0001>

<bundles_post_ra>
// kernel: _forward_impl.1
= control target key start
LH: loop header
LB: loop body
LE: loop exit
PB: predicated region body
PF: predicated region fallthrough
CT: control target
= control target key end

     0   :  { %14 = vsyncpa [#allocation4], 0  ;;  %s796_s0 = inlined_call_operand.<no memory space> [shape: f32[1], index: 0, kind: input, shape index: {}]   ;;  %s797_s1 = inlined_call_operand.vmem [shape: f32[4,16], index: 1, kind: input, shape index: {}]   ;;  %s798_s2 = inlined_call_operand.vmem [shape: bf16[16,128], index: 2, kind: input, shape index: {}]   ;;  %s799_s3 = inlined_call_operand.vmem [shape: f32[1,128], index: 3, kind: input, shape index: {}, may-alias: {3,5,7}]   ;;  %s800_s4 = inlined_call_operand.hbm [shape: bf16[128,128], index: 4, kind: input, shape index: {}]   ;;  %s801_s5 = inlined_call_operand.vmem [shape: f32[1,128], index: 5, kind: input, shape index: {}, may-alias: {3,5,7}]   ;;  %s802_s6 = inlined_call_operand.hbm [shape: bf16[128,128], index: 6, kind: input, shape index: {}]   ;;  %s803_s7 = inlined_call_operand.vmem [shape: f32[1,128], index: 7, kind: input, shape index: {}, may-alias: {3,5,7}]   ;;  %s804_s8 = inlined_call_operand.hbm [shape: f32[4,8], index: 8, kind: output, shape index: {}]  }
   0x1   :  { %15 = vsyncpa [#allocation7], 0 }
   0x2   :  { %16 = vsyncpa [#allocation5], 0  ;;  %s654_s27 = smov [#allocation3]   ;;  %s582_s9 = scalar_lea.hbm %s800_s4, 1024 }
   0x3   :  { %s30_s28 = sshll.u32 %s654_s27, 4  ;;  %p583_p0 = scmp.ne.s32.totalorder %s800_s4, %s582_s9  ;;  %s31_s28 = int_to_ptr.vmem [resolvable:$true] %s30_s28 }
   0x4   :  { %p586_p1 = scmp.lt.u32.totalorder %s582_s9, %s800_s4 }
   0x6   :  { %p588_p2 = pnand %p586_p1, %p583_p0 }
   0x8   :  { %591 = shalt.err (!%p588_p2)
}
   0x9   :  { %s592_s14 = scalar_lea.vmem %s31_s28, 1024  ;;  %p597_p4 = scmp.lt.s32.totalorder %s31_s28, %s31_s28 }
   0xa   :  { %p593_p3 = scmp.ne.s32.totalorder %s31_s28, %s592_s14  ;;  %p598_p5 = scmp.lt.s32.totalorder %s592_s14, %s592_s14 }
   0xc   :  { %p599_p6 = por %p598_p5, %p597_p4 }
   0xe   :  { %p600_p7 = pnand %p599_p6, %p593_p3 }
  0x10   :  { %603 = shalt.err (!%p600_p7)
}
  0x11   :  { %s655_s15 = smov 64   ;;  %s656_s16 = smov 4  }
  0x12   :  { %36 = dma.hbm_to_vmem [thread:$0]  %s800_s4, 1024, %s31_s28, [#allocation4], %s655_s15, %s655_s15, %s656_s16  }
  0x13   :  { %s657_s19 = smov [#allocation6]   ;;  %s604_s23 = scalar_lea.hbm %s802_s6, 1024 }
  0x14   :  { %s44_s20 = sshll.u32 %s657_s19, 4  ;;  %p605_p8 = scmp.ne.s32.totalorder %s802_s6, %s604_s23  ;;  %s45_s20 = int_to_ptr.vmem [resolvable:$true] %s44_s20 }
  0x15   :  { %p608_p9 = scmp.lt.u32.totalorder %s604_s23, %s802_s6 }
  0x17   :  { %p610_p10 = pnand %p608_p9, %p605_p8 }
  0x19   :  { %613 = shalt.err (!%p610_p10)
}
  0x1a   :  { %s614_s29 = scalar_lea.vmem %s45_s20, 1024  ;;  %p619_p12 = scmp.lt.s32.totalorder %s45_s20, %s45_s20 }
  0x1b   :  { %p615_p11 = scmp.ne.s32.totalorder %s45_s20, %s614_s29  ;;  %p620_p13 = scmp.lt.s32.totalorder %s614_s29, %s614_s29 }
  0x1d   :  { %p621_p0 = por %p620_p13, %p619_p12 }
  0x1f   :  { %p622_p1 = pnand %p621_p0, %p615_p11 }
  0x21   :  { %625 = shalt.err (!%p622_p1)
}
  0x22   :  { %50 = dma.hbm_to_vmem [thread:$0]  %s802_s6, 1024, %s45_s20, [#allocation7], %s655_s15, %s655_s15, %s656_s16  }
  0x23   :  { %648 = dma.done.wait [#allocation4], 1024  }
  0x24   :  { %649 = vsyncadd [#allocation4], 4294966272 }
  0x25   :  { %650 = dma.done.wait [#allocation7], 1024  }
  0x26   :  { %651 = vsyncadd [#allocation7], 4294966272  ;;  %v658_v0 = vmov 0.0   ;;  %vm659_vm0 = vmmov 0   ;;  %v565_v1 = vld [vmem:[%s798_s2] sm:$0xff]   ;;  %vm78_vm1 = vcmask 130048  }
  0x27   :  { %499 = vmatprep.subr.bf16.mxu0 %v658_v0  ;;  %501 = vmatprep.mubr.msk.bf16.mxu0 %vm659_vm0, %v658_v0  ;;  %v61_v2 = vld [vmem:[%s797_s1] sm:$0xf]  ;;  %vm122_vm2 = vcmask 1043456   ;;  %v567_v14 = vld [vmem:[#allocation3 + $0x8] sm:$0xff]   ;;  %v568_v15 = vld [vmem:[#allocation3 + $0x10] sm:$0xff]   ;;  %s660_s17 = smov 0.0  }
  0x28   :  { %505 = vmatprep.subr.bf16.mxu1 %v658_v0  ;;  %521 = vmatprep.mubr.msk.bf16.mxu1 %vm659_vm0, %v658_v0  ;;  %v62_v3 = vpack.c.bf16 %v61_v2, %v61_v2  ;;  %v458_v4 = vld [vmem:[%s799_s3] ss:$0 sm:$0xff]  ;;  %v569_v16 = vld [vmem:[#allocation3 + $0x18] sm:$0xff]   ;;  %v571_v18 = vld [vmem:[#allocation3 + $0x28] sm:$0xff]   ;;  %s661_s20 = smov [#allocation8]   ;;  %vm440_vm3 = vcmask 60416  }
  0x29   :  { %500 = vmatpush3.bf16.msra.mxu0 %v565_v1  ;;  %v566_v13 = vld [vmem:[#allocation3] sm:$0xff]   ;;  %v572_v19 = vld [vmem:[#allocation3 + $0x30] sm:$0xff]   ;;  %v573_v20 = vld [vmem:[#allocation3 + $0x38] sm:$0xff]  }
  0x2a   :  { %525 = vmatprep.subr.bf16.mxu0 %v658_v0  ;;  %506 = vmatpush3.bf16.msra.mxu1 %v566_v13  ;;  %v570_v17 = vld [vmem:[#allocation3 + $0x20] sm:$0xff]   ;;  %v575_v49 = vld [vmem:[#allocation6 + $0x8] sm:$0xff]   ;;  %v576_v50 = vld [vmem:[#allocation6 + $0x10] sm:$0xff]  }
  0x2b   :  { %507 = vmatprep.subr.bf16.mxu1 %v658_v0  ;;  %v461_v39 = vld [vmem:[%s801_s5] ss:$0 sm:$0xff]  ;;  %v577_v51 = vld [vmem:[#allocation6 + $0x18] sm:$0xff]   ;;  %v579_v53 = vld [vmem:[#allocation6 + $0x28] sm:$0xff]  }
  0x2c   :  { %502 = vmatmul.mubr.msk.bf16.vlgmr.msra.gmra.mrb[0].mxu0 %vm78_vm1, %v62_v3  ;;  %v574_v48 = vld [vmem:[#allocation6] sm:$0xff]   ;;  %v580_v54 = vld [vmem:[#allocation6 + $0x30] sm:$0xff]   ;;  %v581_v55 = vld [vmem:[#allocation6 + $0x38] sm:$0xff]  }
  0x2d   :  { %541 = vmatprep.mubr.msk.bf16.mxu0 %vm659_vm0, %v658_v0  ;;  %526 = vmatpush3.bf16.msra.mxu0 %v574_v48  ;;  %v578_v52 = vld [vmem:[#allocation6 + $0x20] sm:$0xff]  }
  0x2e   :  { %508 = vmatpush3.bf16.msra.mxu1 %v567_v14  ;;  %527 = vmatprep.subr.bf16.mxu0 %v658_v0 }
  0x2f   :  { %509 = vmatprep.subr.bf16.mxu1 %v658_v0 }
  0x31   :  { %528 = vmatpush3.bf16.msra.mxu0 %v575_v49 }
  0x32   :  { %510 = vmatpush3.bf16.msra.mxu1 %v568_v15  ;;  %529 = vmatprep.subr.bf16.mxu0 %v658_v0 }
  0x33   :  { %511 = vmatprep.subr.bf16.mxu1 %v658_v0 }
  0x35   :  { %530 = vmatpush3.bf16.msra.mxu0 %v576_v50 }
  0x36   :  { %512 = vmatpush3.bf16.msra.mxu1 %v569_v16  ;;  %531 = vmatprep.subr.bf16.mxu0 %v658_v0 }
  0x37   :  { %513 = vmatprep.subr.bf16.mxu1 %v658_v0 }
  0x39   :  { %532 = vmatpush3.bf16.msra.mxu0 %v577_v51 }
  0x3a   :  { %514 = vmatpush3.bf16.msra.mxu1 %v570_v17  ;;  %533 = vmatprep.subr.bf16.mxu0 %v658_v0 }
  0x3b   :  { %515 = vmatprep.subr.bf16.mxu1 %v658_v0 }
  0x3d   :  { %534 = vmatpush3.bf16.msra.mxu0 %v578_v52 }
  0x3e   :  { %516 = vmatpush3.bf16.msra.mxu1 %v571_v18  ;;  %535 = vmatprep.subr.bf16.mxu0 %v658_v0 }
  0x3f   :  { %517 = vmatprep.subr.bf16.mxu1 %v658_v0 }
  0x41   :  { %536 = vmatpush3.bf16.msra.mxu0 %v579_v53 }
  0x42   :  { %518 = vmatpush3.bf16.msra.mxu1 %v572_v19  ;;  %537 = vmatprep.subr.bf16.mxu0 %v658_v0 }
  0x43   :  { %519 = vmatprep.subr.bf16.mxu1 %v658_v0 }
  0x45   :  { %538 = vmatpush3.bf16.msra.mxu0 %v580_v54 }
  0x46   :  { %520 = vmatpush3.bf16.msra.mxu1 %v573_v20  ;;  %539 = vmatprep.subr.bf16.mxu0 %v658_v0 }
  0x49   :  { %540 = vmatpush3.bf16.msra.mxu0 %v581_v55 }
  0xff   :  { %v116_v5 = vpop.f32.mrb[0].mxu0 }
 0x100   :  { %v117_v6 = vadd.f32 %v458_v4, %v116_v5  ;;  %v503_v7 = vpop.f32.mrb[1].mxu0 }
 0x101   :  { %v119_v8 = vpop.f32.mrb[2].mxu0 }
 0x102   :  { %v504_v9 = vpop.f32.mrb[3].mxu0  ;;  %v123_v10 = vsel %vm122_vm2, %v117_v6, 0.0  ;;  %v133_v11 = vmul.f32 %v117_v6, %v117_v6 }
 0x103   :  { %124 = vadd.xlane.f32.xlu0 %v123_v10  ;;  %v470_v10 = vld [vmem:[%s803_s7] ss:$0 sm:$0xff] }
 0x104   :  { %v134_v12 = vsel %vm122_vm2, %v133_v11, 0.0 }
 0x107   :  { %135 = vadd.xlane.f32.xlu0 %v134_v12 }
 0x190   :  { %v125_v21 = vpop.xlane.xlu0 %124 }
 0x191   :  { %v126_v22 = vrot.slane %v125_v21, 4 }
 0x193   :  { %v127_v23 = vadd.f32 %v126_v22, %v125_v21 }
 0x194   :  { %v136_v24 = vpop.xlane.xlu0 %135 }
 0x195   :  { %v128_v25 = vrot.slane %v127_v23, 2  ;;  %v137_v26 = vrot.slane %v136_v24, 4 }
 0x197   :  { %v138_v27 = vadd.f32 %v137_v26, %v136_v24  ;;  %v129_v28 = vadd.f32 %v128_v25, %v127_v23 }
 0x199   :  { %v139_v29 = vrot.slane %v138_v27, 2  ;;  %v130_v30 = vrot.slane %v129_v28, 1 }
 0x19b   :  { %v131_v31 = vadd.f32 %v130_v30, %v129_v28  ;;  %v140_v32 = vadd.f32 %v139_v29, %v138_v27 }
 0x19d   :  { %545 = vpush %v131_v31  ;;  %v141_v33 = vrot.slane %v140_v32, 1 }
 0x19f   :  { %v142_v34 = vadd.f32 %v141_v33, %v140_v32 }
 0x1a1   :  { %547 = vpush %v142_v34 }
 0x1ce   :  { %s546_s1 = spop %545 }
 0x1cf   :  { %s144_s2 = smul.f32 0.0078125, %s546_s1 }
 0x1d1   :  { %s146_s3 = smul.f32 %s144_s2, %s144_s2 }
 0x1d2   :  { %s548_s13 = spop %547 }
 0x1d3   :  { %s145_s14 = smul.f32 0.0078125, %s548_s13 }
 0x1d5   :  { %s147_s15 = ssub.f32 %s145_s14, %s146_s3 }
 0x1d7   :  { %s148_s16 = ssub.f32 0.05, %s147_s15 }
 0x1d9   :  { %s149_s18 = smax.f32 %s660_s17, %s148_s16 }
 0x1da   :  { %s150_s21 = smul.f32 %s149_s18, %s796_s0 }
 0x1dc   :  { %v151_v35 = vstv %s150_s21  ;;  %s448_s21 = sshll.u32 %s661_s20, 4  ;;  %s449_s21 = int_to_ptr.vmem [resolvable:$true] %s448_s21 }
 0x1dd   :  { %v152_v36 = vadd.f32 %v151_v35, %v117_v6  ;;  %s626_s22 = scalar_lea.vmem %s449_s21, 64  ;;  %p631_p3 = scmp.lt.s32.totalorder %s449_s21, %s449_s21 }
 0x1de   :  { %p627_p2 = scmp.ne.s32.totalorder %s449_s21, %s626_s22  ;;  %p632_p4 = scmp.lt.s32.totalorder %s626_s22, %s626_s22 }
 0x1df   :  { %v153_v37 = vmax.f32 %v152_v36, 0.0 }
 0x1e0   :  { %p633_p5 = por %p632_p4, %p631_p3 }
 0x1e1   :  { %v154_v38 = vpack.c.bf16 %v153_v37, %v153_v37 }
 0x1e2   :  { %p634_p6 = pnand %p633_p5, %p627_p2 }
 0x1e3   :  { %522 = vmatmul.mubr.bf16.vlgmr.msra.gmra.mrb[0].mxu1 %v154_v38 }
 0x2b6   :  { %v260_v40 = vpop.f32.mrb[0].mxu1 }
 0x2b7   :  { %v261_v41 = vadd.f32 %v461_v39, %v260_v40  ;;  %v523_v42 = vpop.f32.mrb[1].mxu1 }
 0x2b8   :  { %v263_v43 = vpop.f32.mrb[2].mxu1 }
 0x2b9   :  { %v524_v44 = vpop.f32.mrb[3].mxu1  ;;  %v266_v45 = vsel %vm122_vm2, %v261_v41, 0.0  ;;  %v276_v46 = vmul.f32 %v261_v41, %v261_v41 }
 0x2ba   :  { %267 = vadd.xlane.f32.xlu1 %v266_v45 }
 0x2bb   :  { %v277_v47 = vsel %vm122_vm2, %v276_v46, 0.0 }
 0x2be   :  { %278 = vadd.xlane.f32.xlu1 %v277_v47 }
 0x347   :  { %v268_v56 = vpop.xlane.xlu1 %267 }
 0x348   :  { %v269_v57 = vrot.slane %v268_v56, 4 }
 0x34a   :  { %v270_v58 = vadd.f32 %v269_v57, %v268_v56 }
 0x34b   :  { %v279_v59 = vpop.xlane.xlu1 %278 }
 0x34c   :  { %v271_v60 = vrot.slane %v270_v58, 2  ;;  %v280_v61 = vrot.slane %v279_v59, 4 }
 0x34e   :  { %v281_v62 = vadd.f32 %v280_v61, %v279_v59  ;;  %v272_v63 = vadd.f32 %v271_v60, %v270_v58 }
 0x350   :  { %v282_v1 = vrot.slane %v281_v62, 2  ;;  %v273_v2 = vrot.slane %v272_v63, 1 }
 0x352   :  { %v274_v3 = vadd.f32 %v273_v2, %v272_v63  ;;  %v283_v4 = vadd.f32 %v282_v1, %v281_v62 }
 0x354   :  { %549 = vpush %v274_v3  ;;  %v284_v5 = vrot.slane %v283_v4, 1 }
 0x356   :  { %v285_v6 = vadd.f32 %v284_v5, %v283_v4 }
 0x358   :  { %551 = vpush %v285_v6 }
 0x385   :  { %s550_s5 = spop %549 }
 0x386   :  { %s287_s24 = smul.f32 0.0078125, %s550_s5 }
 0x388   :  { %s289_s25 = smul.f32 %s287_s24, %s287_s24 }
 0x389   :  { %s552_s26 = spop %551 }
 0x38a   :  { %s288_s27 = smul.f32 0.0078125, %s552_s26 }
 0x38c   :  { %s290_s29 = ssub.f32 %s288_s27, %s289_s25 }
 0x38e   :  { %s291_s4 = ssub.f32 0.05, %s290_s29 }
 0x390   :  { %s292_s28 = smax.f32 %s660_s17, %s291_s4 }
 0x391   :  { %s293_s10 = smul.f32 %s292_s28, %s796_s0 }
 0x393   :  { %v294_v0 = vstv %s293_s10 }
 0x394   :  { %v295_v7 = vadd.f32 %v294_v0, %v261_v41 }
 0x396   :  { %v296_v8 = vmax.f32 %v295_v7, 0.0 }
 0x398   :  { %v297_v9 = vpack.c.bf16 %v296_v8, %v296_v8 }
 0x39a   :  { %542 = vmatmul.mubr.bf16.vlgmr.msra.gmra.mrb[4].mxu0 %v297_v9 }
 0x46d   :  { %v403_v11 = vpop.f32.mrb[4].mxu0 }
 0x46e   :  { %v404_v12 = vadd.f32 %v470_v10, %v403_v11  ;;  %v543_v13 = vpop.f32.mrb[5].mxu0 }
 0x46f   :  { %v406_v14 = vpop.f32.mrb[6].mxu0 }
 0x470   :  { %v544_v15 = vpop.f32.mrb[7].mxu0  ;;  %v409_v16 = vsel %vm122_vm2, %v404_v12, 0.0  ;;  %v419_v17 = vmul.f32 %v404_v12, %v404_v12 }
 0x471   :  { %410 = vadd.xlane.f32.xlu0 %v409_v16 }
 0x472   :  { %v420_v18 = vsel %vm122_vm2, %v419_v17, 0.0 }
 0x473   :  { %421 = vadd.xlane.f32.xlu1 %v420_v18 }
 0x4fe   :  { %v411_v19 = vpop.xlane.xlu0 %410 }
 0x4ff   :  { %v412_v20 = vrot.slane %v411_v19, 4 }
 0x500   :  { %v422_v21 = vpop.xlane.xlu1 %421 }
 0x501   :  { %v413_v22 = vadd.f32 %v412_v20, %v411_v19  ;;  %v423_v23 = vrot.slane %v422_v21, 4 }
 0x503   :  { %v414_v24 = vrot.slane %v413_v22, 2  ;;  %v424_v25 = vadd.f32 %v423_v23, %v422_v21 }
 0x505   :  { %v415_v26 = vadd.f32 %v414_v24, %v413_v22  ;;  %v425_v27 = vrot.slane %v424_v25, 2 }
 0x507   :  { %v426_v28 = vadd.f32 %v425_v27, %v424_v25  ;;  %v416_v29 = vrot.slane %v415_v26, 1 }
 0x509   :  { %v417_v30 = vadd.f32 %v416_v29, %v415_v26  ;;  %v427_v31 = vrot.slane %v426_v28, 1 }
 0x50b   :  { %553 = vpush %v417_v30  ;;  %v428_v32 = vadd.f32 %v427_v31, %v426_v28 }
 0x50d   :  { %555 = vpush %v428_v32 }
 0x53c   :  { %s554_s7 = spop %553 }
 0x53d   :  { %s430_s12 = smul.f32 0.03125, %s554_s7 }
 0x53e   :  { %s556_s1 = spop %555 }
 0x53f   :  { %s432_s2 = smul.f32 %s430_s12, %s430_s12 }
 0x540   :  { %s431_s3 = smul.f32 0.03125, %s556_s1 }
 0x542   :  { %s433_s13 = ssub.f32 %s431_s3, %s432_s2 }
 0x544   :  { %s434_s14 = ssub.f32 0.05, %s433_s13 }
 0x546   :  { %s435_s15 = smax.f32 %s660_s17, %s434_s14 }
 0x547   :  { %s436_s19 = smul.f32 %s435_s15, %s796_s0 }
 0x549   :  { %v437_v33 = vstv %s436_s19 }
 0x54a   :  { %v438_v34 = vadd.f32 %v437_v33, %v404_v12 }
 0x54c   :  { %v439_v35 = vmax.f32 %v438_v34, 0.0 }
 0x54e   :  { %441 = vst.msk [vmem:[#allocation8] sm:$0xf] %vm440_vm3, %v439_v35 }
 0x54f   :  { %637 = shalt.err (!%p634_p6)
}
 0x550   :  { %s638_s5 = scalar_lea.hbm %s804_s8, 64 }
 0x551   :  { %p639_p7 = scmp.ne.s32.totalorder %s804_s8, %s638_s5  ;;  %p642_p8 = scmp.lt.u32.totalorder %s638_s5, %s804_s8 }
 0x553   :  { %p644_p9 = pnand %p642_p8, %p639_p7 }
 0x555   :  { %647 = shalt.err (!%p644_p9)
}
 0x556   :  { %451 = dma.vmem_to_hbm [thread:$0]  %s449_s21, 64, %s804_s8, [#allocation5]  }
 0x557   :  { %652 = dma.done.wait [#allocation5], 64  }
 0x558   :  { %653 = vsyncadd [#allocation5], 4294967232 }
 0x559   :  { %455 = vsyncpa [#allocation4], 1 }
 0x55a   :  { %456 = vsyncpa [#allocation7], 1 }
 0x55b   :  { %457 = vsyncpa [#allocation5], 1 }

</bundles_post_ra>
